<compile_context>
chip_gen: v6e
topology: v6e:2x2x1
jax: 0.10.0
libtpu: 0.0.40
codegen_flags: <defaults>
</compile_context>

<pallas_src>
import jax
import jax.numpy as jnp
from jax.experimental import pallas as pl
from jax.experimental.pallas import tpu as pltpu

# Hyperparameters implied by the module (small synthetic sizes).
BERT_SIZE = 32
CONTEXT_LENGTH = 4
CITED_SIZE = 2
OUT_DIM = 2 * BERT_SIZE                    # 64
CTX_IN = CONTEXT_LENGTH * BERT_SIZE        # 128
CIT_IN = CITED_SIZE * BERT_SIZE            # 64
IN_TOTAL = CTX_IN + CIT_IN                 # 192


def _net_kernel(x_ref, w_ref, b_ref, out_ref):
    # Fused linear computed transposed so the result is lane-major:
    #   acc[o, b] = sum_k w[o, k] * x[b, k]   (rhs contracted on its dim 1)
    acc = jax.lax.dot_general(
        w_ref[...], x_ref[...],
        dimension_numbers=(((1,), (1,)), ((), ())),
        preferred_element_type=jnp.float32)           # (OUT_DIM, TILE_B) f32
    d = acc + b_ref[...]                              # (OUT_DIM, 1) bias, lane-broadcast
    # Euclidean distance per column: sublane reduction -> (1, TILE_B), lane-dense.
    out_ref[...] = jnp.sqrt(jnp.sum(d * d, axis=0, keepdims=True))


def net_forward(context, cited, w_ctx, b_ctx, w_cit, b_cit, *, tile_b=512):
    """context: (B, CTX_IN), cited: (B, CIT_IN).  Weights in torch layout
    (out_features, in_features), biases (out_features,).  Returns (B,) f32."""
    assert tile_b % 128 == 0, "tile_b must be a multiple of 128 (lane-dense output)"
    B = context.shape[0]

    # ---- one-time packing (wrapper side) ----------------------------------
    # diff = ctx @ Wc^T - cit @ Wd^T + (bc - bd) = [ctx|cit] @ [Wc | -Wd]^T + b
    w_fused = jnp.concatenate([w_ctx, -w_cit], axis=1).astype(jnp.bfloat16)   # (64, 192)
    b_fused = (b_ctx - b_cit).astype(jnp.float32).reshape(OUT_DIM, 1)         # (64, 1)
    x = jnp.concatenate([context, cited], axis=1).astype(jnp.bfloat16)        # (B, 192)

    b_pad = tile_b * pl.cdiv(B, tile_b)
    if b_pad != B:
        x = jnp.pad(x, ((0, b_pad - B), (0, 0)))
    grid = (b_pad // tile_b,)

    out = pl.pallas_call(
        _net_kernel,
        out_shape=jax.ShapeDtypeStruct((1, b_pad), jnp.float32),
        grid=grid,
        in_specs=[
            pl.BlockSpec((tile_b, IN_TOTAL), lambda i: (i, 0)),    # x tile (pipelined)
            pl.BlockSpec((OUT_DIM, IN_TOTAL), lambda i: (0, 0)),   # fused W (resident)
            pl.BlockSpec((OUT_DIM, 1), lambda i: (0, 0)),          # fused bias (resident)
        ],
        out_specs=pl.BlockSpec((1, tile_b), lambda i: (0, i)),     # lane-dense output
        compiler_params=pltpu.CompilerParams(
            dimension_semantics=("parallel",)),
        cost_estimate=pl.CostEstimate(
            flops=2 * b_pad * IN_TOTAL * OUT_DIM,
            transcendentals=b_pad,
            bytes_accessed=b_pad * IN_TOTAL * 2 + OUT_DIM * IN_TOTAL * 2
                           + OUT_DIM * 4 + b_pad * 4),
    )(x, w_fused, b_fused)
    return out[0, :B]


def init_params(key):
    """Deterministic init mimicking nn.Linear defaults, torch layout (out, in)."""
    k1, k2, k3, k4 = jax.random.split(key, 4)
    bound_c = 1.0 / (CTX_IN ** 0.5)
    bound_d = 1.0 / (CIT_IN ** 0.5)
    w_ctx = jax.random.uniform(k1, (OUT_DIM, CTX_IN), jnp.float32, -bound_c, bound_c)
    b_ctx = jax.random.uniform(k2, (OUT_DIM,), jnp.float32, -bound_c, bound_c)
    w_cit = jax.random.uniform(k3, (OUT_DIM, CIT_IN), jnp.float32, -bound_d, bound_d)
    b_cit = jax.random.uniform(k4, (OUT_DIM,), jnp.float32, -bound_d, bound_d)
    return w_ctx, b_ctx, w_cit, b_cit


def reference_forward(context, cited, w_ctx, b_ctx, w_cit, b_cit):
    hi = jax.lax.Precision.HIGHEST
    ce = jnp.dot(context, w_ctx.T, precision=hi) + b_ctx
    de = jnp.dot(cited, w_cit.T, precision=hi) + b_cit
    return jnp.sqrt(jnp.sum((ce - de) ** 2, axis=1))


if __name__ == "__main__":
    key = jax.random.PRNGKey(0)
    kp, kx, ky = jax.random.split(key, 3)
    w_ctx, b_ctx, w_cit, b_cit = init_params(kp)

    # Small demo batch; non-multiple of the tile to exercise padding + a 3-step grid.
    B = 300
    context = jax.random.normal(kx, (B, CTX_IN), jnp.float32)
    cited = jax.random.normal(ky, (B, CIT_IN), jnp.float32)

    out = net_forward(context, cited, w_ctx, b_ctx, w_cit, b_cit, tile_b=128)
    out = jax.block_until_ready(out)

    # Reference on the same bf16-quantized operands the kernel consumes
    # (bf16 inputs/weights, f32 math), so only summation-order error remains.
    f32 = jnp.float32
    ref = reference_forward(
        context.astype(jnp.bfloat16).astype(f32),
        cited.astype(jnp.bfloat16).astype(f32),
        w_ctx.astype(jnp.bfloat16).astype(f32), b_ctx,
        w_cit.astype(jnp.bfloat16).astype(f32), b_cit)

    assert out.shape == (B,)
    assert jnp.allclose(out, ref, rtol=1e-4, atol=1e-4), float(
        jnp.max(jnp.abs(out - ref)))
    print("KERNEL_OK")
</pallas_src>

<mosaic_0001>
module attributes {stable_mosaic.version = 11 : i64} {
  func.func @_net_kernel(%arg0: i32, %arg1: memref<128x192xbf16, #tpu.memory_space<vmem>>, %arg2: memref<64x192xbf16, #tpu.memory_space<vmem>>, %arg3: memref<64x1xf32, #tpu.memory_space<vmem>>, %arg4: memref<1x128xf32, #tpu.memory_space<vmem>>) attributes {dimension_semantics = [#tpu.dimension_semantics<parallel>], iteration_bounds = array<i64: 3>, scalar_prefetch = 0 : i64, scratch_operands = 0 : i64, tpu.core_type = #tpu.core_type<tc>, window_params = [{transform_indices = @transform_0, window_bounds = array<i64: 128, 192>}, {pipeline_mode = #tpu.pipeline_mode<synchronous>, transform_indices = @transform_1, window_bounds = array<i64: 64, 192>}, {pipeline_mode = #tpu.pipeline_mode<synchronous>, transform_indices = @transform_2, window_bounds = array<i64: 64, 1>}, {transform_indices = @transform_3, window_bounds = array<i64: 1, 128>}]} {
    %c0 = arith.constant 0 : index
    %c0_0 = arith.constant 0 : index
    %0 = vector.load %arg2[%c0, %c0_0] : memref<64x192xbf16, #tpu.memory_space<vmem>>, vector<64x192xbf16>
    %c0_1 = arith.constant 0 : index
    %c0_2 = arith.constant 0 : index
    %1 = vector.load %arg1[%c0_1, %c0_2] : memref<128x192xbf16, #tpu.memory_space<vmem>>, vector<128x192xbf16>
    %cst = arith.constant dense<0.000000e+00> : vector<64x128xf32>
    %2 = tpu.matmul %0, %1, %cst {dimension_numbers = #tpu.dot_dimension_numbers<[1], [1], [0], [0], [0, 0, 1, 0], [], []>} : vector<64x192xbf16>, vector<128x192xbf16>, vector<64x128xf32> -> vector<64x128xf32>
    %c0_3 = arith.constant 0 : index
    %c0_4 = arith.constant 0 : index
    %3 = vector.load %arg3[%c0_3, %c0_4] : memref<64x1xf32, #tpu.memory_space<vmem>>, vector<64x1xf32>
    %4 = vector.broadcast %3 : vector<64x1xf32> to vector<64x128xf32>
    %5 = arith.addf %2, %4 : vector<64x128xf32>
    %6 = arith.mulf %5, %5 : vector<64x128xf32>
    %cst_5 = arith.constant dense<0.000000e+00> : vector<128xf32>
    %7 = vector.multi_reduction <add>, %6, %cst_5 [0] : vector<64x128xf32> to vector<128xf32>
    %8 = vector.shape_cast %7 : vector<128xf32> to vector<1x128xf32>
    %9 = math.sqrt %8 : vector<1x128xf32>
    %c0_6 = arith.constant 0 : index
    %c0_7 = arith.constant 0 : index
    %10 = vector.load %arg4[%c0_6, %c0_7] : memref<1x128xf32, #tpu.memory_space<vmem>>, vector<1x128xf32>
    tpu.vector_store %arg4[%c0_6, %c0_7], %9 {strides = array<i32>} : memref<1x128xf32, #tpu.memory_space<vmem>>, vector<1x128xf32>,
    return
  }
  func.func @transform_0(%arg0: i32) -> (i32, i32) {
    %c0_i32 = arith.constant 0 : i32
    %c0_i32_0 = arith.constant 0 : i32
    return %arg0, %c0_i32 : i32, i32
  }
  func.func @transform_1(%arg0: i32) -> (i32, i32) {
    %c0_i32 = arith.constant 0 : i32
    %c0_i32_0 = arith.constant 0 : i32
    %c0_i32_1 = arith.constant 0 : i32
    return %c0_i32, %c0_i32_0 : i32, i32
  }
  func.func @transform_2(%arg0: i32) -> (i32, i32) {
    %c0_i32 = arith.constant 0 : i32
    %c0_i32_0 = arith.constant 0 : i32
    %c0_i32_1 = arith.constant 0 : i32
    return %c0_i32, %c0_i32_0 : i32, i32
  }
  func.func @transform_3(%arg0: i32) -> (i32, i32) {
    %c0_i32 = arith.constant 0 : i32
    %c0_i32_0 = arith.constant 0 : i32
    return %c0_i32, %arg0 : i32, i32
  }
}

</mosaic_0001>

<bundles_post_ra>
// kernel: tpu_custom_call.1
= control target key start
LH: loop header
LB: loop body
LE: loop exit
PB: predicated region body
PF: predicated region fallthrough
CT: control target
= control target key end

     0   :  { %8 = vsyncpa [#allocation3], 0  ;;  %s958_s0 = inlined_call_operand.vmem [shape: bf16[384,192], index: 0, kind: input, shape index: {}]   ;;  %s959_s1 = inlined_call_operand.vmem [shape: bf16[64,192], index: 1, kind: input, shape index: {}]   ;;  %s960_s2 = inlined_call_operand.vmem [shape: f32[64,1], index: 2, kind: input, shape index: {}]   ;;  %s961_s3 = inlined_call_operand.hbm [shape: f32[1,384], index: 3, kind: output, shape index: {}]  }
   0x1   :  { %10 = vsyncpa [#allocation3 + $0x1], 0  ;;  %s780_s12 = smov 0   ;;  %s782_s13 = smov 0  }
   0x2   :  { %s784_s14 = smov 0   ;;  %s786_s15 = smov 0  }
   0x3 LB: > { %s552_s16 = sadd.s32 4294967295, %s756_s15   ;;  %s553_s17 = sadd.s32 4294967294, %s756_s15   ;;  %s756_s15 = sphi %s786_s15, %s967_s15   ;;  %s752_s14 = sphi %s784_s14, %s966_s14   ;;  %s748_s13 = sphi %s782_s13, %s965_s13   ;;  %s744_s12 = sphi %s780_s12, %s964_s12  }
   0x4   : > { %s803_s18 = sadd.s32 1, %s756_s15   ;;  %s91_s19 = sadd.s32 1, %s752_s14 }
   0x5   : > { %s88_s20 = ssub.s32 %s756_s15, %s803_s18  ;;  %p101_p0 = scmp.ne.s32.totalorder %s752_s14, %s748_s13 }
   0x6   : > { %p89_p1 = scmp.eq.s32.totalorder %s88_s20, 0  ;;  %p102_p2 = scmp.eq.s32.totalorder %s552_s16, 2 }
   0x7   : > { %p107_p3 = scmp.ne.s32.totalorder %s748_s13, %s744_s12  ;;  %p108_p4 = scmp.eq.s32.totalorder %s553_s17, 2 }
   0x8   : > { %s813_s21 = scalar_select %p89_p1, %s752_s14, %s91_s19  }
   0x9   : > { %p815_p5 = por %p102_p2, %p101_p0  ;;  %p819_p6 = por %p108_p4, %p107_p3 }
   0xa   : > { %p556_p7 = scmp.ge.s32.totalorder %s756_s15, 1  ;;  %p142_p8 = scmp.lt.s32.totalorder %s756_s15, 4 }
   0xc   : > { %p143_p9 = pnand %p556_p7, %p142_p8 }
   0xd   : > { %s825_s24 = sshll.u32 (!%p143_p9), %s552_s16, 4  ;;  %s164_s26 = sand.u32 (!%p143_p9), 1, %s748_s13  }
   0xe   : > { %146 = sbr.rel (%p143_p9) target bundleno = 350 (0x15e), region = 32  ;;  %p167_p10 = scmp.lt.s32.totalorder (!%p143_p9), %s825_s24, 47 }
   0xf   : > { %s165_s27 = scalar_lea.vmem (!%p143_p9), [#allocation2], %s164_s26  ;;  %s923_s4 = scalar_lea.hbm (!%p143_p9), %s961_s3, %s825_s24 }
  0x10   : > { %s498_s28 = sshll.u32 (!%p143_p9), %s165_s27, 4  ;;  %s486_s5 = scalar_lea.sflag (!%p143_p9), [#allocation3], %s164_s26  ;;  %s499_s28 = int_to_ptr.vmem [resolvable:$true] %s498_s28 }
  0x11   : > { %s696_s6 = scalar_lea.vmem (!%p143_p9), %s499_s28, 16  ;;  %s759_s7 = smov (!%p143_p9), [#allocation2]  }
  0x12   : > { %p697_p11 = scmp.ne.s32.totalorder (!%p143_p9), %s499_s28, %s696_s6  ;;  %s700_s8 = sshll.u32 (!%p143_p9), %s759_s7, 4  ;;  %s701_s8 = int_to_ptr.vmem [resolvable:$false] %s700_s8 }
  0x13   : > { %v684_v0 = vld [vmem:[%s959_s1 + $0x4] ss:$8 sps:$4 sm:$0xff]   ;;  %vm354_vm0 = vcmask 523264   ;;  %v758_v2 = vmov 0   ;;  %s168_s29 = scalar_select %p167_p10, %s825_s24, 47  ;;  %v200_v4 = vld [vmem:[%s960_s2 + $0x10] sm:$0xff] }
  0x14   : > { %v687_v1 = vld [vmem:[%s959_s1 + $0x24] ss:$8 sps:$4 sm:$0xff]   ;;  %656 = vset.pattern.permute.xlu0 %v758_v2  ;;  %657 = vset.pattern.permute.xlu1 %v758_v2  ;;  %v201_v9 = vld [vmem:[%s960_s2 + $0x18] sm:$0xff]  ;;  %v204_v14 = vld [vmem:[%s960_s2 + $0x30] sm:$0xff]  ;;  %p698_p12 = pnand %p697_p11, %p815_p5  ;;  %s702_s9 = scalar_lea.vmem %s701_s8, 32 }
  0x15   : > { %592 = vmatprep.mubr.msk.bf16.mxu0 %vm354_vm0, %v684_v0  ;;  %594 = vmatprep.mubr.msk.bf16.mxu1 %vm354_vm0, %v687_v1  ;;  %s599_s30 = sshll.u32 %s168_s29, 3  ;;  %v198_v3 = vld [vmem:[%s960_s2] sm:$0xff]  ;;  %v199_v6 = vld [vmem:[%s960_s2 + $0x8] sm:$0xff]  ;;  %v205_v15 = vld [vmem:[%s960_s2 + $0x38] sm:$0xff]  ;;  %p703_p0 = scmp.lt.s32.totalorder %s499_s28, %s701_s8 }
  0x16   : > { %s846_s10 = scalar_lea.vmem %s958_s0, %s599_s30  ;;  %208 = vperm.xlu0 %656, %v198_v3   ;;  %218 = vperm.xlu1 %657, %v200_v4   ;;  %v202_v10 = vld [vmem:[%s960_s2 + $0x20] sm:$0xff]  ;;  %v203_v13 = vld [vmem:[%s960_s2 + $0x28] sm:$0xff]  ;;  %v688_v29 = vld [vmem:[%s959_s1 + $0x14] ss:$8 sps:$4 sm:$0xff]   ;;  %p699_p13 = pneg %p698_p12 }
  0x17   : > { %v658_v5 = vld [vmem:[%s846_s10 + $0x74] ss:$8 sps:$4 sm:$0xff]   ;;  %v660_v7 = vld [vmem:[%s846_s10 + $0x70] ss:$8 sps:$4 sm:$0xff]   ;;  %v661_v8 = vld [vmem:[%s846_s10 + $0x64] ss:$8 sps:$4 sm:$0xff]   ;;  %p704_p1 = scmp.lt.s32.totalorder %s702_s9, %s696_s6 }
  0x18   : > { %584 = vmatprep.subr.msk.bf16.mxu0 %vm354_vm0, %v658_v5  ;;  %600 = vmatprep.subr.msk.bf16.mxu1 %vm354_vm0, %v658_v5  ;;  %v663_v11 = vld [vmem:[%s846_s10 + $0x60] ss:$8 sps:$4 sm:$0xff]   ;;  %v664_v12 = vld [vmem:[%s846_s10 + $0x54] ss:$8 sps:$4 sm:$0xff]   ;;  %v666_v16 = vld [vmem:[%s846_s10 + $0x50] ss:$8 sps:$4 sm:$0xff]  }
  0x19   : > { %392 = vmatpush1.bf16.xpose.msra.mxu0 %v660_v7  ;;  %608 = vmatpush1.bf16.xpose.msra.mxu1 %v660_v7  ;;  %v667_v17 = vld [vmem:[%s846_s10 + $0x44] ss:$8 sps:$4 sm:$0xff]   ;;  %v669_v18 = vld [vmem:[%s846_s10 + $0x40] ss:$8 sps:$4 sm:$0xff]   ;;  %v670_v19 = vld [vmem:[%s846_s10 + $0x34] ss:$8 sps:$4 sm:$0xff]   ;;  %p705_p2 = por %p704_p1, %p703_p0 }
  0x1a   : > { %585 = vmatprep.subr.msk.bf16.mxu0 %vm354_vm0, %v661_v8  ;;  %601 = vmatprep.subr.msk.bf16.mxu1 %vm354_vm0, %v661_v8  ;;  %v672_v20 = vld [vmem:[%s846_s10 + $0x30] ss:$8 sps:$4 sm:$0xff]   ;;  %v673_v21 = vld [vmem:[%s846_s10 + $0x24] ss:$8 sps:$4 sm:$0xff]   ;;  %v675_v22 = vld [vmem:[%s846_s10 + $0x20] ss:$8 sps:$4 sm:$0xff]  }
  0x1b   : > { %213 = vperm.xlu0 %656, %v199_v6   ;;  %223 = vperm.xlu1 %657, %v201_v9   ;;  %v676_v23 = vld [vmem:[%s846_s10 + $0x14] ss:$8 sps:$4 sm:$0xff]   ;;  %v678_v24 = vld [vmem:[%s846_s10 + $0x10] ss:$8 sps:$4 sm:$0xff]   ;;  %v679_v25 = vld [vmem:[%s846_s10 + $0x4] ss:$8 sps:$4 sm:$0xff]   ;;  %p706_p3 = pnand %p705_p2, %p699_p13 }
  0x1c   : > { %v681_v26 = vld [vmem:[%s846_s10] ss:$8 sps:$4 sm:$0xff]   ;;  %v690_v30 = vld [vmem:[%s959_s1 + $0x34] ss:$8 sps:$4 sm:$0xff]   ;;  %v692_v31 = vld [vmem:[%s959_s1 + $0x10] ss:$8 sps:$4 sm:$0xff]  }
  0x1d   : > { %v682_v27 = vld [vmem:[%s959_s1] ss:$8 sps:$4 sm:$0xff]   ;;  %v693_v32 = vld [vmem:[%s959_s1 + $0x30] ss:$8 sps:$4 sm:$0xff]  }
  0x1e   : > { %v685_v28 = vld [vmem:[%s959_s1 + $0x20] ss:$8 sps:$4 sm:$0xff]  }
  0x1f   : > { %228 = vperm.xlu0 %656, %v202_v10   ;;  %233 = vperm.xlu1 %657, %v203_v13  }
  0x21   : > { %394 = vmatpush1.bf16.xpose.msra.mxu0 %v663_v11  ;;  %609 = vmatpush1.bf16.xpose.msra.mxu1 %v663_v11 }
  0x22   : > { %586 = vmatprep.subr.msk.bf16.mxu0 %vm354_vm0, %v664_v12  ;;  %602 = vmatprep.subr.msk.bf16.mxu1 %vm354_vm0, %v664_v12 }
  0x23   : > { %238 = vperm.xlu0 %656, %v204_v14   ;;  %243 = vperm.xlu1 %657, %v205_v15  }
  0x29   : > { %396 = vmatpush1.bf16.xpose.msra.mxu0 %v666_v16  ;;  %610 = vmatpush1.bf16.xpose.msra.mxu1 %v666_v16 }
  0x2a   : > { %587 = vmatprep.subr.msk.bf16.mxu0 %vm354_vm0, %v667_v17  ;;  %603 = vmatprep.subr.msk.bf16.mxu1 %vm354_vm0, %v667_v17 }
  0x31   : > { %398 = vmatpush1.bf16.xpose.msra.mxu0 %v669_v18  ;;  %611 = vmatpush1.bf16.xpose.msra.mxu1 %v669_v18 }
  0x32   : > { %588 = vmatprep.subr.msk.bf16.mxu0 %vm354_vm0, %v670_v19  ;;  %604 = vmatprep.subr.msk.bf16.mxu1 %vm354_vm0, %v670_v19 }
  0x39   : > { %400 = vmatpush1.bf16.xpose.msra.mxu0 %v672_v20  ;;  %612 = vmatpush1.bf16.xpose.msra.mxu1 %v672_v20 }
  0x3a   : > { %589 = vmatprep.subr.msk.bf16.mxu0 %vm354_vm0, %v673_v21  ;;  %605 = vmatprep.subr.msk.bf16.mxu1 %vm354_vm0, %v673_v21 }
  0x41   : > { %402 = vmatpush1.bf16.xpose.msra.mxu0 %v675_v22  ;;  %613 = vmatpush1.bf16.xpose.msra.mxu1 %v675_v22 }
  0x42   : > { %590 = vmatprep.subr.msk.bf16.mxu0 %vm354_vm0, %v676_v23  ;;  %606 = vmatprep.subr.msk.bf16.mxu1 %vm354_vm0, %v676_v23 }
  0x49   : > { %404 = vmatpush1.bf16.xpose.msra.mxu0 %v678_v24  ;;  %614 = vmatpush1.bf16.xpose.msra.mxu1 %v678_v24 }
  0x4a   : > { %591 = vmatprep.subr.msk.bf16.mxu0 %vm354_vm0, %v679_v25  ;;  %607 = vmatprep.subr.msk.bf16.mxu1 %vm354_vm0, %v679_v25 }
  0x51   : > { %406 = vmatpush1.bf16.xpose.msra.mxu0 %v681_v26  ;;  %615 = vmatpush1.bf16.xpose.msra.mxu1 %v681_v26 }
  0x58   : > { %424 = vmatmul.mubr.bf16.vlgmr.msra.gmra.mxu0 %v682_v27  ;;  %440 = vmatmul.mubr.bf16.vlgmr.msra.gmra.mxu1 %v685_v28 }
  0x59   : > { %593 = vmatprep.mubr.msk.bf16.mxu0 %vm354_vm0, %v688_v29  ;;  %595 = vmatprep.mubr.msk.bf16.mxu1 %vm354_vm0, %v690_v30 }
  0x60   : > { %432 = vmatmul.mubr.bf16.gmra.mxu0 %v692_v31  ;;  %448 = vmatmul.mubr.bf16.gmra.mxu1 %v693_v32 }
  0x91   : > { %v209_v33 = vpop.permute.xlu0 %208  ;;  %v219_v34 = vpop.permute.xlu1 %218 }
  0x96   : > { %v214_v39 = vpop.permute.xlu0 %213  ;;  %v224_v42 = vpop.permute.xlu1 %223 }
  0x9a   : > { %v229_v49 = vpop.permute.xlu0 %228  ;;  %v234_v55 = vpop.permute.xlu1 %233 }
  0x9e   : > { %v239_v3 = vpop.permute.xlu0 %238  ;;  %v244_v7 = vpop.permute.xlu1 %243 }
 0x118   : > { %v425_v35 = vpop.f32.mrf.mxu0  ;;  %v441_v36 = vpop.f32.mrf.mxu1 }
 0x119   : > { %v426_v46 = vadd.f32 %v425_v35, %v209_v33  ;;  %v442_v59 = vadd.f32 %v441_v36, %v229_v49 }
 0x11a   : > { %v427_v37 = vpop.f32.mrf.mxu0  ;;  %v443_v38 = vpop.f32.mrf.mxu1 }
 0x11b   : > { %v456_v54 = vmul.f32 %v426_v46, %v426_v46  ;;  %v460_v4 = vmul.f32 %v442_v59, %v442_v59 }
 0x11c   : > { %v428_v40 = vpop.f32.mrf.mxu0  ;;  %v444_v41 = vpop.f32.mrf.mxu1 }
 0x11d   : > { %v429_v43 = vadd.f32 %v428_v40, %v214_v39  ;;  %v445_v0 = vadd.f32 %v444_v41, %v234_v55 }
 0x11e   : > { %v430_v44 = vpop.f32.mrf.mxu0  ;;  %v446_v45 = vpop.f32.mrf.mxu1 }
 0x11f   : > { %v457_v50 = vmul.f32 %v429_v43, %v429_v43  ;;  %v461_v8 = vmul.f32 %v445_v0, %v445_v0 }
 0x120   : > { %v433_v47 = vpop.f32.mrf.mxu0  ;;  %v449_v48 = vpop.f32.mrf.mxu1 }
 0x121   : > { %v434_v51 = vadd.f32 %v433_v47, %v219_v34  ;;  %v464_v60 = vadd.f32 %v457_v50, %v456_v54  ;;  %v450_v5 = vadd.f32 %v449_v48, %v239_v3 }
 0x122   : > { %v435_v52 = vpop.f32.mrf.mxu0  ;;  %v451_v53 = vpop.f32.mrf.mxu1 }
 0x123   : > { %v458_v56 = vmul.f32 %v434_v51, %v434_v51  ;;  %v462_v11 = vmul.f32 %v450_v5, %v450_v5 }
 0x124   : > { %v436_v57 = vpop.f32.mrf.mxu0  ;;  %v452_v58 = vpop.f32.mrf.mxu1 }
 0x125   : > { %v437_v61 = vadd.f32 %v436_v57, %v224_v42  ;;  %v465_v1 = vadd.f32 %v464_v60, %v458_v56  ;;  %v453_v10 = vadd.f32 %v452_v58, %v244_v7 }
 0x126   : > { %v438_v62 = vpop.f32.mrf.mxu0  ;;  %v454_v63 = vpop.f32.mrf.mxu1 }
 0x127   : > { %v459_v2 = vmul.f32 %v437_v61, %v437_v61  ;;  %v463_v13 = vmul.f32 %v453_v10, %v453_v10 }
 0x129   : > { %v466_v6 = vadd.f32 %v465_v1, %v459_v2 }
 0x12b   : > { %v467_v9 = vadd.f32 %v466_v6, %v460_v4 }
 0x12d   : > { %v468_v12 = vadd.f32 %v467_v9, %v461_v8 }
 0x12f   : > { %v469_v14 = vadd.f32 %v468_v12, %v462_v11 }
 0x131   : > { %v470_v15 = vadd.f32 %v469_v14, %v463_v13 }
 0x133   : > { %v471_v16 = vrot.slane %v470_v15, 4 }
 0x135   : > { %v472_v17 = vadd.f32 %v471_v16, %v470_v15 }
 0x137   : > { %v473_v18 = vrot.slane %v472_v17, 2 }
 0x139   : > { %v474_v19 = vadd.f32 %v473_v18, %v472_v17 }
 0x13b   : > { %v475_v20 = vrot.slane %v474_v19, 1 }
 0x13d   : > { %v476_v21 = vadd.f32 %v475_v20, %v474_v19 }
 0x13f   : > { %694 = vrsqrt.f32 %v476_v21  ;;  %vm479_vm1 = vcmp.eq.f32.partialorder %v476_v21, inf  ;;  %v482_v24 = vand.u32 2147483648, %v476_v21  ;;  %vm481_vm2 = vcmp.eq.f32.partialorder %v476_v21, 0.0 }
 0x14c   : > { %v695_v22 = vpop.eup %694 }
 0x14d   : > { %v478_v23 = vmul.f32 %v695_v22, %v476_v21 }
 0x14f   : > { %v480_v25 = vsel %vm479_vm1, %v476_v21, %v478_v23 }
 0x150   : > { %v483_v26 = vsel %vm481_vm2, %v482_v24, %v480_v25 }
 0x151   : > { %484 = vst [vmem:[%s165_s27] sm:$0x1] %v483_v26 }
 0x152   : > { %709 = shalt.err (!%p706_p3)
}
 0x153   : > { %s710_s24 = scalar_lea.hbm %s923_s4, 16  ;;  %s714_s17 = scalar_lea.hbm %s961_s3, 48 }
 0x154   : > { %p711_p4 = scmp.ne.s32.totalorder %s923_s4, %s710_s24  ;;  %p715_p9 = scmp.lt.s32.totalorder %s923_s4, %s961_s3 }
 0x155   : > { %p716_p10 = scmp.lt.s32.totalorder %s714_s17, %s710_s24 }
 0x156   : > { %p712_p7 = pnand %p711_p4, %p815_p5 }
 0x157   : > { %p717_p11 = por %p716_p10, %p715_p9 }
 0x158   : > { %p713_p8 = pneg %p712_p7 }
 0x15a   : > { %p718_p12 = pnand %p717_p11, %p713_p8 }
 0x15c   : > { %721 = shalt.err (!%p718_p12)
}
 0x15d   : > { %616 = dma.vmem_to_hbm [thread:$0]  (%p815_p5), %s499_s28, 16, %s923_s4, %s486_s5  }
 0x15e PF: > { %p622_p13 = scmp.ge.s32.totalorder %s756_s15, 2  ;;  %s510_s20 = sand.u32 1, %s744_s12  }
 0x15f   : > { %s511_s25 = scalar_lea.sflag [#allocation3], %s510_s20 }
 0x160   : > { %p619_p0 = pnand %p622_p13, %p819_p6 }
 0x162   : > { %p620_p1 = pneg %p619_p0 }
 0x164   : > { %739 = dma.done.wait (%p620_p1), %s511_s25, 16  }
 0x165   : > { %741 = vsyncadd (%p620_p1), %s511_s25, 4294967280  ;;  %p13_p2 = scmp.ge.s32.totalorder %s803_s18, 5   ;;  %s964_s12 = smov %s748_s13 }
 0x166   : > { %s965_s13 = smov %s752_s14  ;;  %s966_s14 = smov %s813_s21 }
 0x167   : > { %s967_s15 = smov %s803_s18  ;;  %15 = sbr.rel (!%p13_p2) target bundleno = 3 (0x3), region = 67 }
 0x16c   :  { %515 = vsyncpa [#allocation3], 1 }
 0x16d   :  { %517 = vsyncpa [#allocation3 + $0x1], 1 }

</bundles_post_ra>
